<compile_context>
chip_gen: v6e
topology: v6e:2x2x1
jax: 0.10.0
libtpu: 0.0.40
codegen_flags: <defaults>
</compile_context>

<pallas_src>
import functools

import jax
import jax.numpy as jnp
from jax.experimental import pallas as pl
from jax.experimental.pallas import tpu as pltpu


_VMEM_TILE_BUDGET = 24 * 1024 * 1024   # bytes used to size the row tile
_VMEM_LIMIT_BYTES = 48 * 1024 * 1024   # scoped VMEM limit handed to Mosaic


def _round_up(x, m):
    return ((x + m - 1) // m) * m


def _jsd_kernel(n_rows, tile, mask_rows, p_ref, q_ref, o_ref):
    p = p_ref[...].astype(jnp.float32)
    q = q_ref[...].astype(jnp.float32)

    # Numerically stable softmax pieces (log-space) along the lane (last) axis.
    p_shift = p - jnp.max(p, axis=-1, keepdims=True)
    q_shift = q - jnp.max(q, axis=-1, keepdims=True)
    p_exp = jnp.exp(p_shift)
    q_exp = jnp.exp(q_shift)
    p_den = jnp.sum(p_exp, axis=-1, keepdims=True)          # (tile, 1), >= 1
    q_den = jnp.sum(q_exp, axis=-1, keepdims=True)

    # One reciprocal per row (not per element), then multiply.
    inv_p = 1.0 / p_den
    inv_q = 1.0 / q_den
    p_soft = p_exp * inv_p
    q_soft = q_exp * inv_q

    # s = ps + qs = 2*m; clamp the mixture so log(0) can never produce -inf
    # (which would turn 0 * -inf into NaN when both softmaxes underflow).
    s = p_soft + q_soft
    log_m = jnp.log(jnp.maximum(0.5 * s, jnp.finfo(jnp.float32).tiny))

    # Per-element core term; the row-constant corrections are added after the
    # lane reduction (valid because each softmax row sums to 1).
    t = p_soft * p_shift + q_soft * q_shift - s * log_m

    row = jnp.sum(t, axis=-1, keepdims=True)                # (tile, 1)
    row = row - jnp.log(p_den) - jnp.log(q_den)

    if mask_rows:
        ridx = (pl.program_id(0) * tile
                + jax.lax.broadcasted_iota(jnp.int32, row.shape, 0))
        row = jnp.where(ridx < n_rows, row, 0.0)

    o_ref[...] = row


def jsd(p, q, *, batch_tile=512):
    """Jensen-Shannon divergence of two logit tensors over their last dim."""
    assert p.shape == q.shape, "p and q must have the same shape"

    c = p.shape[-1]
    p2 = p.reshape(-1, c)
    q2 = q.reshape(-1, c)
    n_rows = p2.shape[0]
    itemsize = jnp.dtype(p2.dtype).itemsize

    # Sublane packing: 8 rows for 32-bit dtypes, 16 for 16-bit, 32 for 8-bit.
    row_align = 8 * max(1, 4 // itemsize)

    # VMEM-aware tile: 2 inputs x 2 pipeline buffers in the input dtype, plus an
    # allowance for the live f32 element-wise temporaries inside the kernel.
    # TODO(synk): for C < 128 the vreg lanes are under-filled; packing 128//C rows
    # per register (segmented lane softmax) would recover ~128/C compute throughput.
    bytes_per_row = 2 * 2 * c * itemsize + 6 * c * 4
    vmem_cap = max(row_align,
                   (_VMEM_TILE_BUDGET // bytes_per_row) // row_align * row_align)
    tile = max(row_align, min(batch_tile // row_align * row_align, vmem_cap))

    # Prefer >= 2 grid steps so the "parallel" axis can shard across both
    # TensorCores on v7x (no-op on v5e/v6e).
    if n_rows > row_align:
        half = _round_up(-(-n_rows // 2), row_align)
        tile = min(tile, half)

    n_pad = _round_up(n_rows, tile)
    if n_pad != n_rows:
        pad = ((0, n_pad - n_rows), (0, 0))
        p2 = jnp.pad(p2, pad)
        q2 = jnp.pad(q2, pad)
    num_tiles = n_pad // tile
    mask_rows = n_pad != n_rows

    kernel = functools.partial(_jsd_kernel, n_rows, tile, mask_rows)

    n_el = n_pad * c
    cost = pl.CostEstimate(
        flops=14 * n_el,
        transcendentals=3 * n_el,
        bytes_accessed=2 * n_el * itemsize + n_pad * 4,
    )

    per_row = pl.pallas_call(
        kernel,
        out_shape=jax.ShapeDtypeStruct((n_pad, 1), jnp.float32),
        grid=(num_tiles,),
        in_specs=[
            pl.BlockSpec((tile, c), lambda i: (i, 0)),
            pl.BlockSpec((tile, c), lambda i: (i, 0)),
        ],
        out_specs=pl.BlockSpec((tile, 1), lambda i: (i, 0)),
        compiler_params=pltpu.CompilerParams(
            dimension_semantics=("parallel",),
            vmem_limit_bytes=_VMEM_LIMIT_BYTES),
        cost_estimate=cost,
    )(p2, q2)

    # Tiny final reduction (n_pad f32 values) + batchmean scaling in XLA.
    return 0.5 * jnp.sum(per_row) / n_rows


def jsd_reference(p, q):
    """Pure-JAX reference matching the PyTorch JSD module."""
    c = p.shape[-1]
    ps = jax.nn.softmax(p.reshape(-1, c).astype(jnp.float32), axis=-1)
    qs = jax.nn.softmax(q.reshape(-1, c).astype(jnp.float32), axis=-1)
    m = 0.5 * (ps + qs)
    log_m = jnp.log(m)
    n = ps.shape[0]
    kl_pm = jnp.sum(ps * (jnp.log(ps) - log_m)) / n   # KLDivLoss(m.log(), p.log()), batchmean
    kl_qm = jnp.sum(qs * (jnp.log(qs) - log_m)) / n
    return 0.5 * (kl_pm + kl_qm)


if __name__ == "__main__":
    key = jax.random.PRNGKey(0)
    k1, k2, k3, k4 = jax.random.split(key, 4)

    # Small logit tensors consistent with the module: (batch, seq, vocab).
    p = jax.random.normal(k1, (2, 8, 32), jnp.float32)
    q = jax.random.normal(k2, (2, 8, 32), jnp.float32)

    out = jax.block_until_ready(jsd(p, q))
    ref = jsd_reference(p, q)
    assert out.shape == ()
    assert jnp.allclose(out, ref, atol=1e-5, rtol=1e-5), (out, ref)

    # Ragged row count (21 rows) with a small tile to exercise padding, masking
    # and a multi-step parallel grid.
    p2 = jax.random.normal(k3, (3, 7, 64), jnp.float32)
    q2 = jax.random.normal(k4, (3, 7, 64), jnp.float32)
    out2 = jax.block_until_ready(jsd(p2, q2, batch_tile=8))
    ref2 = jsd_reference(p2, q2)
    assert jnp.allclose(out2, ref2, atol=1e-5, rtol=1e-5), (out2, ref2)

    print("KERNEL_OK")
</pallas_src>

<mosaic_0001>
module attributes {stable_mosaic.version = 11 : i64} {
  func.func @_jsd_kernel(%arg0: i32, %arg1: memref<8x32xf32, #tpu.memory_space<vmem>>, %arg2: memref<8x32xf32, #tpu.memory_space<vmem>>, %arg3: memref<8x1xf32, #tpu.memory_space<vmem>>) attributes {dimension_semantics = [#tpu.dimension_semantics<parallel>], iteration_bounds = array<i64: 2>, scalar_prefetch = 0 : i64, scratch_operands = 0 : i64, tpu.core_type = #tpu.core_type<tc>, window_params = [{transform_indices = @transform_0, window_bounds = array<i64: 8, 32>}, {transform_indices = @transform_1, window_bounds = array<i64: 8, 32>}, {transform_indices = @transform_2, window_bounds = array<i64: 8, 1>}]} {
    %c0 = arith.constant 0 : index
    %c0_0 = arith.constant 0 : index
    %0 = vector.load %arg1[%c0, %c0_0] : memref<8x32xf32, #tpu.memory_space<vmem>>, vector<8x32xf32>
    %c0_1 = arith.constant 0 : index
    %c0_2 = arith.constant 0 : index
    %1 = vector.load %arg2[%c0_1, %c0_2] : memref<8x32xf32, #tpu.memory_space<vmem>>, vector<8x32xf32>
    %cst = arith.constant dense<0xFF800000> : vector<8xf32>
    %2 = vector.multi_reduction <maximumf>, %0, %cst [1] : vector<8x32xf32> to vector<8xf32>
    %3 = vector.shape_cast %2 : vector<8xf32> to vector<8x1xf32>
    %4 = vector.broadcast %3 : vector<8x1xf32> to vector<8x32xf32>
    %5 = arith.subf %0, %4 : vector<8x32xf32>
    %cst_3 = arith.constant dense<0xFF800000> : vector<8xf32>
    %6 = vector.multi_reduction <maximumf>, %1, %cst_3 [1] : vector<8x32xf32> to vector<8xf32>
    %7 = vector.shape_cast %6 : vector<8xf32> to vector<8x1xf32>
    %8 = vector.broadcast %7 : vector<8x1xf32> to vector<8x32xf32>
    %9 = arith.subf %1, %8 : vector<8x32xf32>
    %10 = math.exp %5 : vector<8x32xf32>
    %11 = math.exp %9 : vector<8x32xf32>
    %cst_4 = arith.constant dense<0.000000e+00> : vector<8xf32>
    %12 = vector.multi_reduction <add>, %10, %cst_4 [1] : vector<8x32xf32> to vector<8xf32>
    %13 = vector.shape_cast %12 : vector<8xf32> to vector<8x1xf32>
    %cst_5 = arith.constant dense<0.000000e+00> : vector<8xf32>
    %14 = vector.multi_reduction <add>, %11, %cst_5 [1] : vector<8x32xf32> to vector<8xf32>
    %15 = vector.shape_cast %14 : vector<8xf32> to vector<8x1xf32>
    %cst_6 = arith.constant 1.000000e+00 : f32
    %16 = vector.broadcast %cst_6 : f32 to vector<8x1xf32>
    %17 = arith.divf %16, %13 : vector<8x1xf32>
    %cst_7 = arith.constant 1.000000e+00 : f32
    %18 = vector.broadcast %cst_7 : f32 to vector<8x1xf32>
    %19 = arith.divf %18, %15 : vector<8x1xf32>
    %20 = vector.broadcast %17 : vector<8x1xf32> to vector<8x32xf32>
    %21 = arith.mulf %10, %20 : vector<8x32xf32>
    %22 = vector.broadcast %19 : vector<8x1xf32> to vector<8x32xf32>
    %23 = arith.mulf %11, %22 : vector<8x32xf32>
    %24 = arith.addf %21, %23 : vector<8x32xf32>
    %cst_8 = arith.constant 5.000000e-01 : f32
    %25 = vector.broadcast %cst_8 : f32 to vector<8x32xf32>
    %26 = arith.mulf %25, %24 : vector<8x32xf32>
    %cst_9 = arith.constant 1.17549435E-38 : f32
    %27 = vector.broadcast %cst_9 : f32 to vector<8x32xf32>
    %28 = arith.maximumf %26, %27 : vector<8x32xf32>
    %29 = math.log %28 : vector<8x32xf32>
    %30 = arith.mulf %21, %5 : vector<8x32xf32>
    %31 = arith.mulf %23, %9 : vector<8x32xf32>
    %32 = arith.addf %30, %31 : vector<8x32xf32>
    %33 = arith.mulf %24, %29 : vector<8x32xf32>
    %34 = arith.subf %32, %33 : vector<8x32xf32>
    %cst_10 = arith.constant dense<0.000000e+00> : vector<8xf32>
    %35 = vector.multi_reduction <add>, %34, %cst_10 [1] : vector<8x32xf32> to vector<8xf32>
    %36 = vector.shape_cast %35 : vector<8xf32> to vector<8x1xf32>
    %37 = math.log %13 : vector<8x1xf32>
    %38 = arith.subf %36, %37 : vector<8x1xf32>
    %39 = math.log %15 : vector<8x1xf32>
    %40 = arith.subf %38, %39 : vector<8x1xf32>
    %c0_11 = arith.constant 0 : index
    %c0_12 = arith.constant 0 : index
    %41 = vector.load %arg3[%c0_11, %c0_12] : memref<8x1xf32, #tpu.memory_space<vmem>>, vector<8x1xf32>
    tpu.vector_store %arg3[%c0_11, %c0_12], %40 {strides = array<i32>} : memref<8x1xf32, #tpu.memory_space<vmem>>, vector<8x1xf32>,
    return
  }
  func.func @transform_0(%arg0: i32) -> (i32, i32) {
    %c0_i32 = arith.constant 0 : i32
    %c0_i32_0 = arith.constant 0 : i32
    return %arg0, %c0_i32 : i32, i32
  }
  func.func @transform_1(%arg0: i32) -> (i32, i32) {
    %c0_i32 = arith.constant 0 : i32
    %c0_i32_0 = arith.constant 0 : i32
    return %arg0, %c0_i32 : i32, i32
  }
  func.func @transform_2(%arg0: i32) -> (i32, i32) {
    %c0_i32 = arith.constant 0 : i32
    %c0_i32_0 = arith.constant 0 : i32
    return %arg0, %c0_i32 : i32, i32
  }
}

</mosaic_0001>

<bundles_post_ra>
// kernel: tpu_custom_call.1
= control target key start
LH: loop header
LB: loop body
LE: loop exit
PB: predicated region body
PF: predicated region fallthrough
CT: control target
= control target key end

     0   :  { %7 = vsyncpa [#allocation3], 0  ;;  %s673_s0 = inlined_call_operand.hbm [shape: f32[16,32], index: 0, kind: input, shape index: {}]   ;;  %s674_s1 = inlined_call_operand.hbm [shape: f32[16,32], index: 1, kind: input, shape index: {}]   ;;  %s675_s2 = inlined_call_operand.vmem [shape: f32[16,1], index: 2, kind: output, shape index: {}]  }
   0x1   :  { %9 = vsyncpa [#allocation3 + $0x1], 0 }
   0x2   :  { %10 = vsyncpa [#allocation5], 0 }
   0x3   :  { %12 = vsyncpa [#allocation5 + $0x1], 0  ;;  %s516_s9 = smov 0   ;;  %s518_s10 = smov 0  }
   0x4   :  { %s520_s11 = smov 0   ;;  %s522_s12 = smov 0  }
   0x5 LB: > { %s535_s13 = sadd.s32 4294967295, %s497_s12   ;;  %s538_s14 = sadd.s32 1, %s497_s12   ;;  %s497_s12 = sphi %s522_s12, %s687_s12   ;;  %s493_s11 = sphi %s520_s11, %s686_s11   ;;  %s489_s10 = sphi %s518_s10, %s685_s10   ;;  %s485_s9 = sphi %s516_s9, %s684_s9  }
   0x6   : > { %s22_s15 = ssub.s32 %s497_s12, %s538_s14  ;;  %s25_s16 = sadd.s32 1, %s493_s11 }
   0x7   : > { %p23_p0 = scmp.eq.s32.totalorder %s22_s15, 0  ;;  %p32_p1 = scmp.ne.s32.totalorder %s493_s11, %s489_s10 }
   0x8   : > { %p33_p2 = scmp.eq.s32.totalorder %s497_s12, 0  ;;  %p38_p3 = scmp.ne.s32.totalorder %s489_s10, %s485_s9 }
   0x9   : > { %s548_s17 = scalar_select %p23_p0, %s493_s11, %s25_s16  }
   0xa   : > { %p34_p4 = por %p33_p2, %p32_p1  ;;  %p39_p5 = scmp.eq.s32.totalorder %s535_s13, 0 }
   0xb   : > { %p356_p6 = scmp.lt.s32.totalorder %s497_s12, 2  ;;  %s557_s19 = sand.u32 1, %s493_s11  }
   0xc   : > { %p552_p7 = por %p39_p5, %p38_p3  ;;  %s335_s20 = sshll.u32 %s557_s19, 3 }
   0xd   : > { %s336_s21 = sshll.u32 %s497_s12, 7  ;;  %s118_s25 = scalar_lea.vmem [#allocation2], %s335_s20 }
   0xe   : > { %s677_s18 = scalar_select %p552_p7, 1, 0 }
   0xf   : > { %s566_s24 = scalar_lea.hbm %s673_s0, %s336_s21  ;;  %s125_s26 = sshll.u32 %s118_s25, 4  ;;  %s570_s26 = int_to_ptr.vmem [resolvable:$true] %s125_s26 }
  0x10   : > { %p572_p8 = pnand %p356_p6, %p34_p4  ;;  %s115_s28 = scalar_lea.sflag [#allocation3], %s557_s19 }
  0x11   : > { %s403_s29 = scalar_lea.hbm %s566_s24, 128  ;;  %s408_s4 = scalar_lea.hbm %s673_s0, 256 }
  0x12   : > { %p404_p11 = scmp.ne.s32.totalorder %s566_s24, %s403_s29  ;;  %p405_p12 = pneg %p572_p8 }
  0x13   : > { %p409_p1 = scmp.lt.s32.totalorder %s566_s24, %s673_s0  ;;  %p410_p2 = scmp.lt.s32.totalorder %s408_s4, %s403_s29 }
  0x14   : > { %p406_p13 = pnand %p405_p12, %p404_p11 }
  0x15   : > { %p411_p3 = por %p410_p2, %p409_p1 }
  0x16   : > { %p407_p0 = pneg %p406_p13 }
  0x18   : > { %p412_p4 = pnand %p411_p3, %p407_p0 }
  0x1a   : > { %415 = shalt.err (!%p412_p4)
}
  0x1b   : > { %s416_s7 = scalar_lea.vmem %s570_s26, 128  ;;  %s499_s8 = smov [#allocation2]  }
  0x1c   : > { %p417_p5 = scmp.ne.s32.totalorder %s570_s26, %s416_s7  ;;  %s421_s9 = sshll.u32 %s499_s8, 4  ;;  %s422_s9 = int_to_ptr.vmem [resolvable:$false] %s421_s9 }
  0x1d   : > { %s423_s15 = scalar_lea.vmem %s422_s9, 256  ;;  %p424_p13 = scmp.lt.s32.totalorder %s570_s26, %s422_s9 }
  0x1e   : > { %p419_p6 = pnand %p417_p5, %p405_p12  ;;  %p425_p9 = scmp.lt.s32.totalorder %s423_s15, %s416_s7 }
  0x20   : > { %p420_p11 = pneg %p419_p6  ;;  %p426_p10 = por %p425_p9, %p424_p13 }
  0x22   : > { %p427_p1 = pnand %p426_p10, %p420_p11 }
  0x24   : > { %430 = shalt.err (!%p427_p1)
}
  0x25   : > { %352 = dma.hbm_to_vmem [thread:$0]  (!%p572_p8), %s566_s24, 128, %s570_s26, %s115_s28  }
  0x26   : > { %p679_p0 = scmp.lt.s32.totalorder %s497_s12, 3  ;;  %p680_p2 = scmp.ge.s32.totalorder %s497_s12, 1 }
  0x27   : > { %s616_s25 = scalar_lea.hbm %s674_s1, %s336_s21  ;;  %s136_s29 = scalar_lea.vmem [#allocation4], %s335_s20 }
  0x28   : > { %p607_p3 = pnand %p680_p2, %p679_p0  ;;  %s143_s30 = sshll.u32 %s136_s29, 4  ;;  %s144_s30 = int_to_ptr.vmem [resolvable:$true] %s143_s30 }
  0x29   : > { %s133_s24 = scalar_lea.sflag [#allocation5], %s557_s19  ;;  %s431_s26 = scalar_lea.hbm %s616_s25, 128 }
  0x2a   : > { %s681_s16 = scalar_select %p607_p3, 1, 0 }
  0x2b   : > { %p432_p9 = scmp.ne.s32.totalorder %s616_s25, %s431_s26  ;;  %s436_s3 = scalar_lea.hbm %s674_s1, 256 }
  0x2c   : > { %p437_p5 = scmp.lt.s32.totalorder %s616_s25, %s674_s1  ;;  %p438_p6 = scmp.lt.s32.totalorder %s436_s3, %s431_s26 }
  0x2d   : > { %p434_p10 = pnand %p432_p9, %p405_p12 }
  0x2e   : > { %p439_p11 = por %p438_p6, %p437_p5 }
  0x2f   : > { %p435_p4 = pneg %p434_p10 }
  0x31   : > { %p440_p13 = pnand %p439_p11, %p435_p4 }
  0x33   : > { %443 = shalt.err (!%p440_p13)
}
  0x34   : > { %s444_s20 = scalar_lea.vmem %s144_s30, 128  ;;  %s500_s19 = smov [#allocation4]  }
  0x35   : > { %p445_p1 = scmp.ne.s32.totalorder %s144_s30, %s444_s20  ;;  %s449_s5 = sshll.u32 %s500_s19, 4  ;;  %s450_s5 = int_to_ptr.vmem [resolvable:$false] %s449_s5 }
  0x36   : > { %s451_s6 = scalar_lea.vmem %s450_s5, 256  ;;  %p452_p9 = scmp.lt.s32.totalorder %s144_s30, %s450_s5 }
  0x37   : > { %p447_p0 = pnand %p445_p1, %p405_p12  ;;  %p453_p10 = scmp.lt.s32.totalorder %s451_s6, %s444_s20 }
  0x39   : > { %p448_p2 = pneg %p447_p0  ;;  %p454_p7 = por %p453_p10, %p452_p9 }
  0x3b   : > { %p455_p3 = pnand %p454_p7, %p448_p2 }
  0x3d   : > { %458 = shalt.err (!%p455_p3)
}
  0x3e   : > { %355 = dma.hbm_to_vmem [thread:$0]  (!%p572_p8), %s616_s25, 128, %s144_s30, %s133_s24  }
  0x3f   : > { %p682_p4 = scmp.ne.s32.totalorder %s681_s16, 0 }
  0x40   : > { %s154_s7 = sand.u32 (!%p682_p4), 1, %s489_s10   ;;  %p683_p12 = scmp.ne.s32.totalorder (!%p682_p4), %s677_s18, 0 }
  0x41   : > { %152 = sbr.rel (%p682_p4) target bundleno = 560 (0x230), region = 28  ;;  %s340_s8 = sshll.u32 (!%p682_p4), %s154_s7, 3 }
  0x42   : > { %s155_s9 = scalar_lea.sflag (!%p682_p4), [#allocation3], %s154_s7  ;;  %s158_s15 = scalar_lea.vmem (!%p682_p4), [#allocation2], %s340_s8 }
  0x46   : > { %476 = dma.done.wait (%p683_p12), %s155_s9, 128  }
  0x47   : > { %478 = vsyncadd (%p683_p12), %s155_s9, 4294967168  ;;  %s164_s22 = scalar_lea.sflag [#allocation5], %s154_s7  ;;  %s167_s23 = scalar_lea.vmem [#allocation4], %s340_s8 }
  0x48   : > { %480 = dma.done.wait (%p683_p12), %s164_s22, 128  }
  0x49   : > { %482 = vsyncadd (%p683_p12), %s164_s22, 4294967168  ;;  %vm198_vm0 = vcmask 261120   ;;  %v196_v0 = vld [vmem:[%s158_s15] sm:$0xff]  ;;  %v197_v1 = vld [vmem:[%s167_s23] sm:$0xff]  ;;  %p192_p7 = scmp.lt.s32.totalorder %s535_s13, 1  ;;  %vm242_vm1 = vcmask 7168  }
  0x4a   : > { %v199_v2 = vsel %vm198_vm0, %v196_v0, -inf  ;;  %v203_v3 = vsel %vm198_vm0, %v197_v1, -inf }
  0x4b   : > { %200 = vmax.xlane.f32.xlu0 %v199_v2  ;;  %s689_s13 = smov (!%p192_p7, %s535_s13), 1 }
  0x4c   : > { %s342_s18 = sshll.u32 %s689_s13, 3 }
  0x4d   : > { %s195_s25 = scalar_lea.vmem %s675_s2, %s342_s18 }
  0x4f   : > { %204 = vmax.xlane.f32.xlu0 %v203_v3 }
  0xd4   : > { %v201_v4 = vpop.xlane.xlu0 %200 }
  0xd5   : > { %v202_v5 = vsub.f32 %v196_v0, %v201_v4 }
  0xd7   : > { %v207_v6 = vmul.f32 1.442695, %v202_v5 }
  0xd8   : > { %v205_v7 = vpop.xlane.xlu0 %204 }
  0xd9   : > { %389 = vpow2.f32 %v207_v6  ;;  %v206_v8 = vsub.f32 %v197_v1, %v205_v7 }
  0xdb   : > { %v209_v9 = vmul.f32 1.442695, %v206_v8 }
  0xdd   : > { %391 = vpow2.f32 %v209_v9 }
  0xe6   : > { %v390_v10 = vpop.eup %389 }
  0xe7   : > { %v211_v11 = vsel %vm198_vm0, %v390_v10, 0.0 }
  0xe8   : > { %212 = vadd.xlane.f32.xlu1 %v211_v11 }
  0xea   : > { %v392_v12 = vpop.eup %391 }
  0xeb   : > { %v214_v13 = vsel %vm198_vm0, %v392_v12, 0.0 }
  0xec   : > { %215 = vadd.xlane.f32.xlu1 %v214_v13 }
 0x171   : > { %v213_v14 = vpop.xlane.xlu1 %212 }
 0x172   : > { %393 = vrcp.f32 %v213_v14 }
 0x175   : > { %v216_v15 = vpop.xlane.xlu1 %215 }
 0x176   : > { %395 = vrcp.f32 %v216_v15 }
 0x17f   : > { %v394_v16 = vpop.eup %393 }
 0x180   : > { %v221_v18 = vmul.f32 %v394_v16, %v390_v10 }
 0x182   : > { %v228_v26 = vmul.f32 %v221_v18, %v202_v5 }
 0x183   : > { %v396_v17 = vpop.eup %395 }
 0x184   : > { %v222_v19 = vmul.f32 %v396_v17, %v392_v12 }
 0x186   : > { %v223_v20 = vadd.f32 %v222_v19, %v221_v18  ;;  %v229_v23 = vmul.f32 %v222_v19, %v206_v8 }
 0x188   : > { %v224_v21 = vmul.f32 0.5, %v223_v20  ;;  %v230_v27 = vadd.f32 %v229_v23, %v228_v26 }
 0x18a   : > { %v225_v22 = vmax.f32 %v224_v21, 1.1754944e-38 }
 0x18c   : > { %397 = vlog2.f32 %v225_v22 }
 0x18d   : > { %399 = vlog2.f32 %v213_v14 }
 0x18e   : > { %401 = vlog2.f32 %v216_v15 }
 0x199   : > { %v398_v24 = vpop.eup %397 }
 0x19a   : > { %v227_v25 = vmul.f32 0.6931472, %v398_v24  ;;  %v400_v31 = vpop.eup %399 }
 0x19b   : > { %v402_v32 = vpop.eup %401  ;;  %v237_v33 = vmul.f32 0.6931472, %v400_v31 }
 0x19c   : > { %v231_v28 = vmul.f32 %v227_v25, %v223_v20  ;;  %v240_v35 = vmul.f32 0.6931472, %v402_v32 }
 0x19e   : > { %v232_v29 = vsub.f32 %v230_v27, %v231_v28 }
 0x1a0   : > { %v233_v30 = vsel %vm198_vm0, %v232_v29, 0.0 }
 0x1a1   : > { %234 = vadd.xlane.f32.xlu0 %v233_v30 }
 0x22a   : > { %v235_v34 = vpop.xlane.xlu0 %234 }
 0x22b   : > { %v238_v36 = vsub.f32 %v235_v34, %v237_v33 }
 0x22d   : > { %v241_v37 = vsub.f32 %v238_v36, %v240_v35 }
 0x22f   : > { %243 = vst.msk [vmem:[%s195_s25] sm:$0xff] %vm242_vm1, %v241_v37 }
 0x230 PF: > { %p15_p8 = scmp.ge.s32.totalorder %s538_s14, 4   ;;  %s684_s9 = smov %s489_s10 }
 0x231   : > { %s685_s10 = smov %s493_s11  ;;  %s686_s11 = smov %s548_s17 }
 0x232   : > { %s687_s12 = smov %s538_s14  ;;  %17 = sbr.rel (!%p15_p8) target bundleno = 5 (0x5), region = 81 }
 0x237   :  { %263 = vsyncpa [#allocation3], 1 }
 0x238   :  { %265 = vsyncpa [#allocation3 + $0x1], 1 }
 0x239   :  { %266 = vsyncpa [#allocation5], 1 }
 0x23a   :  { %268 = vsyncpa [#allocation5 + $0x1], 1 }

</bundles_post_ra>
